<compile_context>
chip_gen: v5e
topology: v5e:2x2
jax: 0.10.0
libtpu: 0.0.40
codegen_flags: <defaults>
</compile_context>

<pallas_src>
import functools
import math

import jax
import jax.numpy as jnp
from jax import lax
from jax.experimental import pallas as pl
from jax.experimental.pallas import tpu as pltpu

# Leaves headroom on v7x (64 MiB physical VMEM per TC); well within v5e/v6e 128 MiB.
_VMEM_LIMIT_BYTES = 48 * 1024 * 1024
_LN_EPS = 1e-5


# ----------------------------- small helpers --------------------------------

def _erf_approx(x):
    # Abramowitz & Stegun 7.1.26 (max abs error 1.5e-7); elementwise-only so it
    # lowers cleanly on the VPU/EUP.
    a1, a2, a3, a4, a5 = 0.254829592, -0.284496736, 1.421413741, -1.453152027, 1.061405429
    p = 0.3275911
    sgn = jnp.where(x >= 0.0, 1.0, -1.0)
    ax = jnp.abs(x)
    t = 1.0 / (1.0 + p * ax)
    poly = ((((a5 * t + a4) * t + a3) * t + a2) * t + a1) * t
    return sgn * (1.0 - poly * jnp.exp(-ax * ax))


def _gelu_exact(x):
    # Matches torch.nn.GELU() (exact erf form) to ~1.5e-7.
    return 0.5 * x * (1.0 + _erf_approx(x * (1.0 / math.sqrt(2.0))))


def _pick_tile(dim, target, align):
    """Largest tile <= target that is a multiple of `align` and divides `dim`.
    Returns the full dim when dim <= target (full-extent blocks are always legal),
    and None when no aligned divisor exists (caller pads or falls back)."""
    if dim <= target:
        return dim
    t = (target // align) * align
    while t >= align:
        if dim % t == 0:
            return t
        t -= align
    return None


def _layernorm_f32(y, gamma, beta, eps):
    mean = jnp.mean(y, axis=-1, keepdims=True)
    c = y - mean
    var = jnp.mean(c * c, axis=-1, keepdims=True)
    return c * lax.rsqrt(var + eps) * gamma + beta


# ------------------------- kernel 1: fused MSA + LN1 -------------------------

def _msa_ln_kernel(x_ref, qkv_w_ref, qkv_b_ref, out_w_ref, out_b_ref,
                   g_ref, beta_ref, o_ref, qkv_scr,
                   *, num_heads, head_dim, tq, eps):
    # Grid: (batch, query-tile).  x_ref: full (N, E) per batch (resident across qi).
    qi = pl.program_id(1)
    E = num_heads * head_dim

    # Compute QKV for the whole sequence ONCE per batch element; keep it resident
    # in a bf16 VMEM scratch (it is only ever a matmul operand afterwards).
    @pl.when(qi == 0)
    def _compute_qkv():
        xb = x_ref[...].astype(jnp.bfloat16)                                # (N, E)
        qkv = jnp.dot(xb, qkv_w_ref[...],
                      preferred_element_type=jnp.float32) + qkv_b_ref[...]  # (N, 3E) f32
        qkv_scr[...] = qkv.astype(jnp.bfloat16)

    row0 = pl.multiple_of(qi * tq, tq)
    x_q = x_ref[pl.ds(row0, tq), :]                    # (tq, E) f32 residual rows
    inv_scale = 1.0 / math.sqrt(head_dim)

    # Per-head attention; output projection accumulated per head (no ctx concat).
    acc = jnp.zeros((tq, E), jnp.float32)
    for h in range(num_heads):                         # static unroll over heads
        # [Q_allheads | K_allheads | V_allheads] column layout -> head-aligned slices.
        q = qkv_scr[pl.ds(row0, tq), h * head_dim:(h + 1) * head_dim]           # (tq, D) bf16
        k = qkv_scr[:, E + h * head_dim: E + (h + 1) * head_dim]                # (N, D)  bf16
        v = qkv_scr[:, 2 * E + h * head_dim: 2 * E + (h + 1) * head_dim]        # (N, D)  bf16

        # scores (tq, N): contract last dims directly (no k.T materialized).
        s = lax.dot_general(q, k, (((1,), (1,)), ((), ())),
                            preferred_element_type=jnp.float32)
        # Stable softmax over keys; the module divides by sqrt(head_dim) AFTER the
        # softmax -> fold it into the row reciprocal (EUP slot).
        s_max = jnp.max(s, axis=-1, keepdims=True)
        e = jnp.exp(s - s_max)
        p = e * (inv_scale * pl.reciprocal(jnp.sum(e, axis=-1, keepdims=True),
                                           approx=True))
        ctx_h = jnp.dot(p.astype(jnp.bfloat16), v,
                        preferred_element_type=jnp.float32)                      # (tq, D)
        acc = acc + jnp.dot(ctx_h.astype(jnp.bfloat16),
                            out_w_ref[h * head_dim:(h + 1) * head_dim, :],
                            preferred_element_type=jnp.float32)                  # (tq, E)

    # Output bias + residual + LayerNorm1 (all fused, one HBM write per tile).
    y = acc + out_b_ref[...] + x_q
    o_ref[...] = _layernorm_f32(y, g_ref[...], beta_ref[...], eps).astype(o_ref.dtype)


def pallas_msa_ln(x, params, num_heads, eps=_LN_EPS):
    B, N, E = x.shape
    assert E % num_heads == 0
    D = E // num_heads
    tq = _pick_tile(N, 256, 16)
    if tq is None:
        tq = N  # padding the sequence would perturb the softmax; keep full rows
    kernel = functools.partial(_msa_ln_kernel, num_heads=num_heads,
                               head_dim=D, tq=tq, eps=eps)
    # NOTE(v7x): add pipeline_mode=pl.Buffered(1) to these constant-index weight
    # specs to avoid double-buffering large weights (block index never changes).
    const2d = lambda shape: pl.BlockSpec(shape, lambda b, qi: (0, 0))
    return pl.pallas_call(
        kernel,
        out_shape=jax.ShapeDtypeStruct((B, N, E), x.dtype),
        grid=(B, N // tq),
        in_specs=[
            pl.BlockSpec((None, N, E), lambda b, qi: (b, 0, 0)),  # x (resident per batch)
            const2d((E, 3 * E)),                                  # qkv W^T (bf16, [Q|K|V])
            const2d((1, 3 * E)),                                  # qkv bias (f32, permuted)
            const2d((E, E)),                                      # out-proj W^T (bf16)
            const2d((1, E)),                                      # out-proj bias
            const2d((1, E)),                                      # ln1 gamma
            const2d((1, E)),                                      # ln1 beta
        ],
        out_specs=pl.BlockSpec((None, tq, E), lambda b, qi: (b, qi, 0)),
        scratch_shapes=[pltpu.VMEM((N, 3 * E), jnp.bfloat16)],     # resident QKV
        compiler_params=pltpu.CompilerParams(
            dimension_semantics=("parallel", "arbitrary"),
            vmem_limit_bytes=_VMEM_LIMIT_BYTES),
    )(x, params["qkv_w_t"], params["qkv_b"], params["out_w_t"], params["out_b"],
      params["ln1_g"], params["ln1_b"])


# ------------- kernel 2: fused FFN (Lin1 + GELU + Lin2) + res + LN2 ----------

def _ffn_ln_kernel(h_ref, w1_ref, b1_ref, w2_ref, b2_ref, g_ref, beta_ref,
                   o_ref, acc_ref, *, eps):
    # Grid: (row tile, hidden tile).  h_ref (tm, E) is resident across the hidden
    # axis and serves both as the matmul input and the LN2 residual.
    j = pl.program_id(1)

    @pl.when(j == 0)
    def _init():
        acc_ref[...] = jnp.zeros_like(acc_ref)

    x = h_ref[...]                                                     # (tm, E) f32
    hidden = jnp.dot(x.astype(jnp.bfloat16), w1_ref[...],
                     preferred_element_type=jnp.float32) + b1_ref[...]  # (tm, th) f32
    a = _gelu_exact(hidden)                                            # f32 elementwise
    # TODO(synk): nn.Dropout (p=0.2) is identity in eval mode; training-mode dropout not implemented.
    acc_ref[...] += jnp.dot(a.astype(jnp.bfloat16), w2_ref[...],
                            preferred_element_type=jnp.float32)        # (tm, E) f32

    @pl.when(j == pl.num_programs(1) - 1)
    def _finalize():
        y = acc_ref[...] + b2_ref[...] + x                              # bias + residual(h)
        o_ref[...] = _layernorm_f32(y, g_ref[...], beta_ref[...], eps).astype(o_ref.dtype)


def pallas_ffn_ln(h2d, params, eps=_LN_EPS):
    """LayerNorm2(h + (gelu(h @ W1 + b1) @ W2 + b2)); h2d: (M, E).
    The (M, Z*E) intermediate never leaves VMEM."""
    M, E = h2d.shape
    HZ = params["ff_w1_t"].shape[1]

    # Row tile: bf16 sublane align (16).  If M has no aligned divisor <= target,
    # pad M up to a tile multiple instead of silently using the full dimension.
    tm = _pick_tile(M, 512, 16)
    if tm is None:
        tm = (512 // 16) * 16
    Mp = pl.cdiv(M, tm) * tm
    hp = jnp.pad(h2d, ((0, Mp - M), (0, 0))) if Mp != M else h2d

    # Hidden tile (prefer 256-multiples for the v6e/v7x 256x256 MXU); full-extent
    # fallback keeps the block legal and bounded (hidden = z * E).
    th = _pick_tile(HZ, 512, 128)
    if th is None:
        th = HZ

    kernel = functools.partial(_ffn_ln_kernel, eps=eps)
    out = pl.pallas_call(
        kernel,
        out_shape=jax.ShapeDtypeStruct((Mp, E), h2d.dtype),
        grid=(Mp // tm, HZ // th),
        in_specs=[
            pl.BlockSpec((tm, E), lambda i, j: (i, 0)),   # h: matmul input AND residual
            pl.BlockSpec((E, th), lambda i, j: (0, j)),   # W1^T (bf16)
            pl.BlockSpec((1, th), lambda i, j: (0, j)),   # b1
            pl.BlockSpec((th, E), lambda i, j: (j, 0)),   # W2^T (bf16)
            pl.BlockSpec((1, E), lambda i, j: (0, 0)),    # b2
            pl.BlockSpec((1, E), lambda i, j: (0, 0)),    # ln2 gamma
            pl.BlockSpec((1, E), lambda i, j: (0, 0)),    # ln2 beta
        ],
        out_specs=pl.BlockSpec((tm, E), lambda i, j: (i, 0)),
        scratch_shapes=[pltpu.VMEM((tm, E), jnp.float32)],
        compiler_params=pltpu.CompilerParams(
            dimension_semantics=("parallel", "arbitrary"),
            vmem_limit_bytes=_VMEM_LIMIT_BYTES),
    )(hp, params["ff_w1_t"], params["ff_b1"], params["ff_w2_t"], params["ff_b2"],
      params["ln2_g"], params["ln2_b"])
    return out[:M] if Mp != M else out


# ------------------------------ forward (host) -------------------------------

def transformer_encoder_forward(x, params, num_heads, eps=_LN_EPS):
    """Reproduces TransformerEncoder.forward (eval mode).  x: (B, N, E) f32."""
    B, N, E = x.shape
    # 1) MSA + residual + LayerNorm1, fully fused (one HBM round trip).
    h = pallas_msa_ln(x, params, num_heads, eps=eps)            # (B, N, E)
    # 2) FFN (Linear1 + GELU + Linear2) + residual + LayerNorm2, fully fused.
    out = pallas_ffn_ln(h.reshape(B * N, E), params, eps=eps)   # (B*N, E)
    return out.reshape(B, N, E)


# ------------------------------ reference (jnp) -------------------------------

def _layernorm_ref(x, g, b, eps=_LN_EPS):
    mean = jnp.mean(x, axis=-1, keepdims=True)
    var = jnp.mean((x - mean) ** 2, axis=-1, keepdims=True)
    return (x - mean) / jnp.sqrt(var + eps) * g + b


def transformer_encoder_reference(x, params, num_heads, eps=_LN_EPS):
    """Same math as the PyTorch module with the same bf16-operand / f32-accumulate
    matmul precision policy as the kernels (weights already stored bf16)."""
    B, N, E = x.shape
    H, D = num_heads, E // num_heads
    bf = jnp.bfloat16
    x2 = x.reshape(B * N, E)
    # MSA (params use the [Q|K|V]-per-head column layout; a pure relabeling of the
    # module's 'b n (h qkv e) -> qkv b h n e' rearrange).
    qkv = (jnp.dot(x2.astype(bf), params["qkv_w_t"],
                   preferred_element_type=jnp.float32) + params["qkv_b"]).astype(bf)
    qkv = qkv.reshape(B, N, 3, H, D)
    q = qkv[:, :, 0].transpose(0, 2, 1, 3)
    k = qkv[:, :, 1].transpose(0, 2, 1, 3)
    v = qkv[:, :, 2].transpose(0, 2, 1, 3)
    att = jnp.einsum("bhqd,bhkd->bhqk", q, k, preferred_element_type=jnp.float32)
    att = jax.nn.softmax(att, axis=-1) / math.sqrt(D)           # softmax, then scale
    ctx = jnp.einsum("bhqk,bhkd->bhqd", att.astype(bf), v,
                     preferred_element_type=jnp.float32)
    ctx = ctx.transpose(0, 2, 1, 3).reshape(B * N, E)
    msa = (jnp.dot(ctx.astype(bf), params["out_w_t"],
                   preferred_element_type=jnp.float32) + params["out_b"]).reshape(B, N, E)
    h = _layernorm_ref(msa + x, params["ln1_g"][0], params["ln1_b"][0], eps)
    # FeedFwd (exact erf GELU, eval-mode dropout = identity)
    h2 = h.reshape(B * N, E)
    hid = jnp.dot(h2.astype(bf), params["ff_w1_t"],
                  preferred_element_type=jnp.float32) + params["ff_b1"]
    a = jax.nn.gelu(hid, approximate=False)
    ff = jnp.dot(a.astype(bf), params["ff_w2_t"],
                 preferred_element_type=jnp.float32) + params["ff_b2"]
    out = _layernorm_ref(h2 + ff, params["ln2_g"][0], params["ln2_b"][0], eps)
    return out.reshape(B, N, E)


# ----------------------------------- main -------------------------------------

if __name__ == "__main__":
    # Small shapes consistent with the module: x (B, N, E), H heads, z=5 FFN expansion.
    B, N, E, H, Z = 2, 8, 32, 4, 5
    D = E // H

    key = jax.random.PRNGKey(0)
    ks = jax.random.split(key, 13)
    x = jax.random.normal(ks[0], (B, N, E), dtype=jnp.float32)

    def lin_init(kw, kb, fan_in, fan_out, scale=0.05):
        # nn.Linear shapes: W (out, in), b (out,)
        w = jax.random.normal(kw, (fan_out, fan_in), jnp.float32) * scale
        b = jax.random.normal(kb, (fan_out,), jnp.float32) * scale
        return w, b

    qkv_w, qkv_b = lin_init(ks[1], ks[2], E, 3 * E)
    out_w, out_b = lin_init(ks[3], ks[4], E, E)
    ff_w1, ff_b1 = lin_init(ks[5], ks[6], E, Z * E)
    ff_w2, ff_b2 = lin_init(ks[7], ks[8], Z * E, E)
    ln1_g = 1.0 + 0.1 * jax.random.normal(ks[9], (1, E), jnp.float32)
    ln1_b = 0.1 * jax.random.normal(ks[10], (1, E), jnp.float32)
    ln2_g = 1.0 + 0.1 * jax.random.normal(ks[11], (1, E), jnp.float32)
    ln2_b = 0.1 * jax.random.normal(ks[12], (1, E), jnp.float32)

    # Host-side, one-time param prep:
    #  * qkv output axis is (h, qkv, d) in the module; relabel to (qkv, h, d) so the
    #    kernel sees [Q_allheads | K_allheads | V_allheads] with head-aligned slices.
    #  * all matmul weights pre-transposed to (in, out) and cast to bf16 (f32 MXU
    #    accumulation via preferred_element_type); biases / LN params stay f32.
    qkv_w_qhd = qkv_w.reshape(H, 3, D, E).transpose(1, 0, 2, 3).reshape(3 * E, E)
    qkv_b_qhd = qkv_b.reshape(H, 3, D).transpose(1, 0, 2).reshape(3 * E)

    params = {
        "qkv_w_t": qkv_w_qhd.T.astype(jnp.bfloat16), "qkv_b": qkv_b_qhd.reshape(1, 3 * E),
        "out_w_t": out_w.T.astype(jnp.bfloat16),     "out_b": out_b.reshape(1, E),
        "ff_w1_t": ff_w1.T.astype(jnp.bfloat16),     "ff_b1": ff_b1.reshape(1, Z * E),
        "ff_w2_t": ff_w2.T.astype(jnp.bfloat16),     "ff_b2": ff_b2.reshape(1, E),
        "ln1_g": ln1_g, "ln1_b": ln1_b, "ln2_g": ln2_g, "ln2_b": ln2_b,
    }

    out = transformer_encoder_forward(x, params, num_heads=H)
    out = jax.block_until_ready(out)

    ref = transformer_encoder_reference(x, params, num_heads=H)
    assert out.shape == (B, N, E)
    # Tolerance absorbs the approximate EUP reciprocal in the softmax and the erf
    # polynomial in GELU (matmul precision is identical: bf16 operands, f32 acc).
    max_err = float(jnp.max(jnp.abs(out - ref)))
    assert jnp.allclose(out, ref, atol=2e-3, rtol=2e-3), \
        f"mismatch vs reference (max abs err {max_err})"

    print("KERNEL_OK")
</pallas_src>

<mosaic_0001>
module attributes {stable_mosaic.version = 11 : i64} {
  func.func @_msa_ln_kernel(%arg0: i32, %arg1: i32, %arg2: memref<1x8x32xf32, #tpu.memory_space<vmem>>, %arg3: memref<32x96xbf16, #tpu.memory_space<vmem>>, %arg4: memref<1x96xf32, #tpu.memory_space<vmem>>, %arg5: memref<32x32xbf16, #tpu.memory_space<vmem>>, %arg6: memref<1x32xf32, #tpu.memory_space<vmem>>, %arg7: memref<1x32xf32, #tpu.memory_space<vmem>>, %arg8: memref<1x32xf32, #tpu.memory_space<vmem>>, %arg9: memref<1x8x32xf32, #tpu.memory_space<vmem>>, %arg10: memref<8x96xbf16, #tpu.memory_space<vmem>>) attributes {dimension_semantics = [#tpu.dimension_semantics<parallel>, #tpu.dimension_semantics<arbitrary>], iteration_bounds = array<i64: 2, 1>, scalar_prefetch = 0 : i64, scratch_operands = 1 : i64, tpu.core_type = #tpu.core_type<tc>, window_params = [{transform_indices = @transform_0, window_bounds = array<i64: 1, 8, 32>}, {pipeline_mode = #tpu.pipeline_mode<synchronous>, transform_indices = @transform_1, window_bounds = array<i64: 32, 96>}, {pipeline_mode = #tpu.pipeline_mode<synchronous>, transform_indices = @transform_2, window_bounds = array<i64: 1, 96>}, {pipeline_mode = #tpu.pipeline_mode<synchronous>, transform_indices = @transform_3, window_bounds = array<i64: 32, 32>}, {pipeline_mode = #tpu.pipeline_mode<synchronous>, transform_indices = @transform_4, window_bounds = array<i64: 1, 32>}, {pipeline_mode = #tpu.pipeline_mode<synchronous>, transform_indices = @transform_5, window_bounds = array<i64: 1, 32>}, {pipeline_mode = #tpu.pipeline_mode<synchronous>, transform_indices = @transform_6, window_bounds = array<i64: 1, 32>}, {transform_indices = @transform_7, window_bounds = array<i64: 1, 8, 32>}]} {
    %c0_i32 = arith.constant 0 : i32
    %0 = arith.cmpi eq, %arg1, %c0_i32 : i32
    %1 = arith.extui %0 : i1 to i32
    %c0_i32_0 = arith.constant 0 : i32
    %2 = arith.cmpi ne, %1, %c0_i32_0 : i32
    scf.if %2 {
      %c0_57 = arith.constant 0 : index
      %c0_58 = arith.constant 0 : index
      %c0_59 = arith.constant 0 : index
      %130 = vector.load %arg2[%c0_57, %c0_58, %c0_59] : memref<1x8x32xf32, #tpu.memory_space<vmem>>, vector<1x8x32xf32>
      %131 = vector.shape_cast %130 : vector<1x8x32xf32> to vector<8x32xf32>
      %132 = arith.truncf %131 : vector<8x32xf32> to vector<8x32xbf16>
      %c0_60 = arith.constant 0 : index
      %c0_61 = arith.constant 0 : index
      %133 = vector.load %arg3[%c0_60, %c0_61] : memref<32x96xbf16, #tpu.memory_space<vmem>>, vector<32x96xbf16>
      %cst_62 = arith.constant dense<0.000000e+00> : vector<8x96xf32>
      %134 = tpu.matmul %132, %133, %cst_62 {dimension_numbers = #tpu.dot_dimension_numbers<[1], [0], [0], [1], [0, 0, 1, 1], [], []>} : vector<8x32xbf16>, vector<32x96xbf16>, vector<8x96xf32> -> vector<8x96xf32>
      %c0_63 = arith.constant 0 : index
      %c0_64 = arith.constant 0 : index
      %135 = vector.load %arg4[%c0_63, %c0_64] : memref<1x96xf32, #tpu.memory_space<vmem>>, vector<1x96xf32>
      %136 = vector.broadcast %135 : vector<1x96xf32> to vector<8x96xf32>
      %137 = arith.addf %134, %136 : vector<8x96xf32>
      %138 = arith.truncf %137 : vector<8x96xf32> to vector<8x96xbf16>
      %c0_65 = arith.constant 0 : index
      %c0_66 = arith.constant 0 : index
      %139 = vector.load %arg10[%c0_65, %c0_66] : memref<8x96xbf16, #tpu.memory_space<vmem>>, vector<8x96xbf16>
      tpu.vector_store %arg10[%c0_65, %c0_66], %138 {strides = array<i32>} : memref<8x96xbf16, #tpu.memory_space<vmem>>, vector<8x96xbf16>,
    } else {
    }
    %c8_i32 = arith.constant 8 : i32
    %3 = arith.muli %arg1, %c8_i32 : i32
    %4 = tpu.assume_multiple %3, 8 : i32
    %c0 = arith.constant 0 : index
    %5 = arith.index_cast %4 : i32 to index
    %c0_1 = arith.constant 0 : index
    %6 = vector.load %arg2[%c0, %5, %c0_1] : memref<1x8x32xf32, #tpu.memory_space<vmem>>, vector<1x8x32xf32>
    %7 = vector.shape_cast %6 : vector<1x8x32xf32> to vector<8x32xf32>
    %cst = arith.constant 0.000000e+00 : f32
    %8 = vector.broadcast %cst : f32 to vector<8x32xf32>
    %9 = arith.index_cast %4 : i32 to index
    %c0_2 = arith.constant 0 : index
    %10 = vector.load %arg10[%9, %c0_2] : memref<8x96xbf16, #tpu.memory_space<vmem>>, vector<8x8xbf16>
    %c0_3 = arith.constant 0 : index
    %c32 = arith.constant 32 : index
    %11 = vector.load %arg10[%c0_3, %c32] : memref<8x96xbf16, #tpu.memory_space<vmem>>, vector<8x8xbf16>
    %c0_4 = arith.constant 0 : index
    %c64 = arith.constant 64 : index
    %12 = vector.load %arg10[%c0_4, %c64] : memref<8x96xbf16, #tpu.memory_space<vmem>>, vector<8x8xbf16>
    %cst_5 = arith.constant dense<0.000000e+00> : vector<8x8xf32>
    %13 = tpu.matmul %10, %11, %cst_5 {dimension_numbers = #tpu.dot_dimension_numbers<[1], [1], [0], [0], [0, 0, 1, 0], [], []>} : vector<8x8xbf16>, vector<8x8xbf16>, vector<8x8xf32> -> vector<8x8xf32>
    %cst_6 = arith.constant dense<0xFF800000> : vector<8xf32>
    %14 = vector.multi_reduction <maximumf>, %13, %cst_6 [1] : vector<8x8xf32> to vector<8xf32>
    %15 = vector.shape_cast %14 : vector<8xf32> to vector<8x1xf32>
    %16 = vector.broadcast %15 : vector<8x1xf32> to vector<8x8xf32>
    %17 = arith.subf %13, %16 : vector<8x8xf32>
    %18 = math.exp %17 : vector<8x8xf32>
    %cst_7 = arith.constant dense<0.000000e+00> : vector<8xf32>
    %19 = vector.multi_reduction <add>, %18, %cst_7 [1] : vector<8x8xf32> to vector<8xf32>
    %20 = vector.shape_cast %19 : vector<8xf32> to vector<8x1xf32>
    %21 = tpu.reciprocal %20 {approx = true} : vector<8x1xf32> -> vector<8x1xf32>
    %cst_8 = arith.constant 0.353553385 : f32
    %22 = vector.broadcast %cst_8 : f32 to vector<8x1xf32>
    %23 = arith.mulf %22, %21 : vector<8x1xf32>
    %24 = vector.broadcast %23 : vector<8x1xf32> to vector<8x8xf32>
    %25 = arith.mulf %18, %24 : vector<8x8xf32>
    %26 = arith.truncf %25 : vector<8x8xf32> to vector<8x8xbf16>
    %cst_9 = arith.constant dense<0.000000e+00> : vector<8x8xf32>
    %27 = tpu.matmul %26, %12, %cst_9 {dimension_numbers = #tpu.dot_dimension_numbers<[1], [0], [0], [1], [0, 0, 1, 1], [], []>} : vector<8x8xbf16>, vector<8x8xbf16>, vector<8x8xf32> -> vector<8x8xf32>
    %28 = arith.truncf %27 : vector<8x8xf32> to vector<8x8xbf16>
    %c0_10 = arith.constant 0 : index
    %c0_11 = arith.constant 0 : index
    %29 = vector.load %arg5[%c0_10, %c0_11] : memref<32x32xbf16, #tpu.memory_space<vmem>>, vector<8x32xbf16>
    %cst_12 = arith.constant dense<0.000000e+00> : vector<8x32xf32>
    %30 = tpu.matmul %28, %29, %cst_12 {dimension_numbers = #tpu.dot_dimension_numbers<[1], [0], [0], [1], [0, 0, 1, 1], [], []>} : vector<8x8xbf16>, vector<8x32xbf16>, vector<8x32xf32> -> vector<8x32xf32>
    %31 = arith.addf %8, %30 : vector<8x32xf32>
    %32 = arith.index_cast %4 : i32 to index
    %c8 = arith.constant 8 : index
    %33 = vector.load %arg10[%32, %c8] : memref<8x96xbf16, #tpu.memory_space<vmem>>, vector<8x8xbf16>
    %c0_13 = arith.constant 0 : index
    %c40 = arith.constant 40 : index
    %34 = vector.load %arg10[%c0_13, %c40] : memref<8x96xbf16, #tpu.memory_space<vmem>>, vector<8x8xbf16>
    %c0_14 = arith.constant 0 : index
    %c72 = arith.constant 72 : index
    %35 = vector.load %arg10[%c0_14, %c72] : memref<8x96xbf16, #tpu.memory_space<vmem>>, vector<8x8xbf16>
    %cst_15 = arith.constant dense<0.000000e+00> : vector<8x8xf32>
    %36 = tpu.matmul %33, %34, %cst_15 {dimension_numbers = #tpu.dot_dimension_numbers<[1], [1], [0], [0], [0, 0, 1, 0], [], []>} : vector<8x8xbf16>, vector<8x8xbf16>, vector<8x8xf32> -> vector<8x8xf32>
    %cst_16 = arith.constant dense<0xFF800000> : vector<8xf32>
    %37 = vector.multi_reduction <maximumf>, %36, %cst_16 [1] : vector<8x8xf32> to vector<8xf32>
    %38 = vector.shape_cast %37 : vector<8xf32> to vector<8x1xf32>
    %39 = vector.broadcast %38 : vector<8x1xf32> to vector<8x8xf32>
    %40 = arith.subf %36, %39 : vector<8x8xf32>
    %41 = math.exp %40 : vector<8x8xf32>
    %cst_17 = arith.constant dense<0.000000e+00> : vector<8xf32>
    %42 = vector.multi_reduction <add>, %41, %cst_17 [1] : vector<8x8xf32> to vector<8xf32>
    %43 = vector.shape_cast %42 : vector<8xf32> to vector<8x1xf32>
    %44 = tpu.reciprocal %43 {approx = true} : vector<8x1xf32> -> vector<8x1xf32>
    %cst_18 = arith.constant 0.353553385 : f32
    %45 = vector.broadcast %cst_18 : f32 to vector<8x1xf32>
    %46 = arith.mulf %45, %44 : vector<8x1xf32>
    %47 = vector.broadcast %46 : vector<8x1xf32> to vector<8x8xf32>
    %48 = arith.mulf %41, %47 : vector<8x8xf32>
    %49 = arith.truncf %48 : vector<8x8xf32> to vector<8x8xbf16>
    %cst_19 = arith.constant dense<0.000000e+00> : vector<8x8xf32>
    %50 = tpu.matmul %49, %35, %cst_19 {dimension_numbers = #tpu.dot_dimension_numbers<[1], [0], [0], [1], [0, 0, 1, 1], [], []>} : vector<8x8xbf16>, vector<8x8xbf16>, vector<8x8xf32> -> vector<8x8xf32>
    %51 = arith.truncf %50 : vector<8x8xf32> to vector<8x8xbf16>
    %c8_20 = arith.constant 8 : index
    %c0_21 = arith.constant 0 : index
    %52 = vector.load %arg5[%c8_20, %c0_21] : memref<32x32xbf16, #tpu.memory_space<vmem>>, vector<8x32xbf16>
    %cst_22 = arith.constant dense<0.000000e+00> : vector<8x32xf32>
    %53 = tpu.matmul %51, %52, %cst_22 {dimension_numbers = #tpu.dot_dimension_numbers<[1], [0], [0], [1], [0, 0, 1, 1], [], []>} : vector<8x8xbf16>, vector<8x32xbf16>, vector<8x32xf32> -> vector<8x32xf32>
    %54 = arith.addf %31, %53 : vector<8x32xf32>
    %55 = arith.index_cast %4 : i32 to index
    %c16 = arith.constant 16 : index
    %56 = vector.load %arg10[%55, %c16] : memref<8x96xbf16, #tpu.memory_space<vmem>>, vector<8x8xbf16>
    %c0_23 = arith.constant 0 : index
    %c48 = arith.constant 48 : index
    %57 = vector.load %arg10[%c0_23, %c48] : memref<8x96xbf16, #tpu.memory_space<vmem>>, vector<8x8xbf16>
    %c0_24 = arith.constant 0 : index
    %c80 = arith.constant 80 : index
    %58 = vector.load %arg10[%c0_24, %c80] : memref<8x96xbf16, #tpu.memory_space<vmem>>, vector<8x8xbf16>
    %cst_25 = arith.constant dense<0.000000e+00> : vector<8x8xf32>
    %59 = tpu.matmul %56, %57, %cst_25 {dimension_numbers = #tpu.dot_dimension_numbers<[1], [1], [0], [0], [0, 0, 1, 0], [], []>} : vector<8x8xbf16>, vector<8x8xbf16>, vector<8x8xf32> -> vector<8x8xf32>
    %cst_26 = arith.constant dense<0xFF800000> : vector<8xf32>
    %60 = vector.multi_reduction <maximumf>, %59, %cst_26 [1] : vector<8x8xf32> to vector<8xf32>
    %61 = vector.shape_cast %60 : vector<8xf32> to vector<8x1xf32>
    %62 = vector.broadcast %61 : vector<8x1xf32> to vector<8x8xf32>
    %63 = arith.subf %59, %62 : vector<8x8xf32>
    %64 = math.exp %63 : vector<8x8xf32>
    %cst_27 = arith.constant dense<0.000000e+00> : vector<8xf32>
    %65 = vector.multi_reduction <add>, %64, %cst_27 [1] : vector<8x8xf32> to vector<8xf32>
    %66 = vector.shape_cast %65 : vector<8xf32> to vector<8x1xf32>
    %67 = tpu.reciprocal %66 {approx = true} : vector<8x1xf32> -> vector<8x1xf32>
    %cst_28 = arith.constant 0.353553385 : f32
    %68 = vector.broadcast %cst_28 : f32 to vector<8x1xf32>
    %69 = arith.mulf %68, %67 : vector<8x1xf32>
    %70 = vector.broadcast %69 : vector<8x1xf32> to vector<8x8xf32>
    %71 = arith.mulf %64, %70 : vector<8x8xf32>
    %72 = arith.truncf %71 : vector<8x8xf32> to vector<8x8xbf16>
    %cst_29 = arith.constant dense<0.000000e+00> : vector<8x8xf32>
    %73 = tpu.matmul %72, %58, %cst_29 {dimension_numbers = #tpu.dot_dimension_numbers<[1], [0], [0], [1], [0, 0, 1, 1], [], []>} : vector<8x8xbf16>, vector<8x8xbf16>, vector<8x8xf32> -> vector<8x8xf32>
    %74 = arith.truncf %73 : vector<8x8xf32> to vector<8x8xbf16>
    %c16_30 = arith.constant 16 : index
    %c0_31 = arith.constant 0 : index
    %75 = vector.load %arg5[%c16_30, %c0_31] : memref<32x32xbf16, #tpu.memory_space<vmem>>, vector<8x32xbf16>
    %cst_32 = arith.constant dense<0.000000e+00> : vector<8x32xf32>
    %76 = tpu.matmul %74, %75, %cst_32 {dimension_numbers = #tpu.dot_dimension_numbers<[1], [0], [0], [1], [0, 0, 1, 1], [], []>} : vector<8x8xbf16>, vector<8x32xbf16>, vector<8x32xf32> -> vector<8x32xf32>
    %77 = arith.addf %54, %76 : vector<8x32xf32>
    %78 = arith.index_cast %4 : i32 to index
    %c24 = arith.constant 24 : index
    %79 = vector.load %arg10[%78, %c24] : memref<8x96xbf16, #tpu.memory_space<vmem>>, vector<8x8xbf16>
    %c0_33 = arith.constant 0 : index
    %c56 = arith.constant 56 : index
    %80 = vector.load %arg10[%c0_33, %c56] : memref<8x96xbf16, #tpu.memory_space<vmem>>, vector<8x8xbf16>
    %c0_34 = arith.constant 0 : index
    %c88 = arith.constant 88 : index
    %81 = vector.load %arg10[%c0_34, %c88] : memref<8x96xbf16, #tpu.memory_space<vmem>>, vector<8x8xbf16>
    %cst_35 = arith.constant dense<0.000000e+00> : vector<8x8xf32>
    %82 = tpu.matmul %79, %80, %cst_35 {dimension_numbers = #tpu.dot_dimension_numbers<[1], [1], [0], [0], [0, 0, 1, 0], [], []>} : vector<8x8xbf16>, vector<8x8xbf16>, vector<8x8xf32> -> vector<8x8xf32>
    %cst_36 = arith.constant dense<0xFF800000> : vector<8xf32>
    %83 = vector.multi_reduction <maximumf>, %82, %cst_36 [1] : vector<8x8xf32> to vector<8xf32>
    %84 = vector.shape_cast %83 : vector<8xf32> to vector<8x1xf32>
    %85 = vector.broadcast %84 : vector<8x1xf32> to vector<8x8xf32>
    %86 = arith.subf %82, %85 : vector<8x8xf32>
    %87 = math.exp %86 : vector<8x8xf32>
    %cst_37 = arith.constant dense<0.000000e+00> : vector<8xf32>
    %88 = vector.multi_reduction <add>, %87, %cst_37 [1] : vector<8x8xf32> to vector<8xf32>
    %89 = vector.shape_cast %88 : vector<8xf32> to vector<8x1xf32>
    %90 = tpu.reciprocal %89 {approx = true} : vector<8x1xf32> -> vector<8x1xf32>
    %cst_38 = arith.constant 0.353553385 : f32
    %91 = vector.broadcast %cst_38 : f32 to vector<8x1xf32>
    %92 = arith.mulf %91, %90 : vector<8x1xf32>
    %93 = vector.broadcast %92 : vector<8x1xf32> to vector<8x8xf32>
    %94 = arith.mulf %87, %93 : vector<8x8xf32>
    %95 = arith.truncf %94 : vector<8x8xf32> to vector<8x8xbf16>
    %cst_39 = arith.constant dense<0.000000e+00> : vector<8x8xf32>
    %96 = tpu.matmul %95, %81, %cst_39 {dimension_numbers = #tpu.dot_dimension_numbers<[1], [0], [0], [1], [0, 0, 1, 1], [], []>} : vector<8x8xbf16>, vector<8x8xbf16>, vector<8x8xf32> -> vector<8x8xf32>
    %97 = arith.truncf %96 : vector<8x8xf32> to vector<8x8xbf16>
    %c24_40 = arith.constant 24 : index
    %c0_41 = arith.constant 0 : index
    %98 = vector.load %arg5[%c24_40, %c0_41] : memref<32x32xbf16, #tpu.memory_space<vmem>>, vector<8x32xbf16>
    %cst_42 = arith.constant dense<0.000000e+00> : vector<8x32xf32>
    %99 = tpu.matmul %97, %98, %cst_42 {dimension_numbers = #tpu.dot_dimension_numbers<[1], [0], [0], [1], [0, 0, 1, 1], [], []>} : vector<8x8xbf16>, vector<8x32xbf16>, vector<8x32xf32> -> vector<8x32xf32>
    %100 = arith.addf %77, %99 : vector<8x32xf32>
    %c0_43 = arith.constant 0 : index
    %c0_44 = arith.constant 0 : index
    %101 = vector.load %arg6[%c0_43, %c0_44] : memref<1x32xf32, #tpu.memory_space<vmem>>, vector<1x32xf32>
    %102 = vector.broadcast %101 : vector<1x32xf32> to vector<8x32xf32>
    %103 = arith.addf %100, %102 : vector<8x32xf32>
    %104 = arith.addf %103, %7 : vector<8x32xf32>
    %c0_45 = arith.constant 0 : index
    %c0_46 = arith.constant 0 : index
    %105 = vector.load %arg7[%c0_45, %c0_46] : memref<1x32xf32, #tpu.memory_space<vmem>>, vector<1x32xf32>
    %c0_47 = arith.constant 0 : index
    %c0_48 = arith.constant 0 : index
    %106 = vector.load %arg8[%c0_47, %c0_48] : memref<1x32xf32, #tpu.memory_space<vmem>>, vector<1x32xf32>
    %cst_49 = arith.constant dense<0.000000e+00> : vector<8xf32>
    %107 = vector.multi_reduction <add>, %104, %cst_49 [1] : vector<8x32xf32> to vector<8xf32>
    %108 = vector.shape_cast %107 : vector<8xf32> to vector<8x1xf32>
    %cst_50 = arith.constant 3.200000e+01 : f32
    %109 = vector.broadcast %cst_50 : f32 to vector<8x1xf32>
    %110 = arith.divf %108, %109 : vector<8x1xf32>
    %111 = vector.broadcast %110 : vector<8x1xf32> to vector<8x32xf32>
    %112 = arith.subf %104, %111 : vector<8x32xf32>
    %113 = arith.mulf %112, %112 : vector<8x32xf32>
    %cst_51 = arith.constant dense<0.000000e+00> : vector<8xf32>
    %114 = vector.multi_reduction <add>, %113, %cst_51 [1] : vector<8x32xf32> to vector<8xf32>
    %115 = vector.shape_cast %114 : vector<8xf32> to vector<8x1xf32>
    %cst_52 = arith.constant 3.200000e+01 : f32
    %116 = vector.broadcast %cst_52 : f32 to vector<8x1xf32>
    %117 = arith.divf %115, %116 : vector<8x1xf32>
    %cst_53 = arith.constant 9.99999974E-6 : f32
    %118 = vector.broadcast %cst_53 : f32 to vector<8x1xf32>
    %119 = arith.addf %117, %118 : vector<8x1xf32>
    %120 = math.rsqrt %119 : vector<8x1xf32>
    %121 = vector.broadcast %120 : vector<8x1xf32> to vector<8x32xf32>
    %122 = arith.mulf %112, %121 : vector<8x32xf32>
    %123 = vector.broadcast %105 : vector<1x32xf32> to vector<8x32xf32>
    %124 = arith.mulf %122, %123 : vector<8x32xf32>
    %125 = vector.broadcast %106 : vector<1x32xf32> to vector<8x32xf32>
    %126 = arith.addf %124, %125 : vector<8x32xf32>
    %c0_54 = arith.constant 0 : index
    %c0_55 = arith.constant 0 : index
    %c0_56 = arith.constant 0 : index
    %127 = vector.load %arg9[%c0_54, %c0_55, %c0_56] : memref<1x8x32xf32, #tpu.memory_space<vmem>>, vector<1x8x32xf32>
    %128 = vector.shape_cast %127 : vector<1x8x32xf32> to vector<8x32xf32>
    %129 = vector.shape_cast %126 : vector<8x32xf32> to vector<1x8x32xf32>
    tpu.vector_store %arg9[%c0_54, %c0_55, %c0_56], %129 {strides = array<i32>} : memref<1x8x32xf32, #tpu.memory_space<vmem>>, vector<1x8x32xf32>,
    return
  }
  func.func @transform_0(%arg0: i32, %arg1: i32) -> (i32, i32, i32) {
    %c0_i32 = arith.constant 0 : i32
    %c0_i32_0 = arith.constant 0 : i32
    %c0_i32_1 = arith.constant 0 : i32
    return %arg0, %c0_i32, %c0_i32_0 : i32, i32, i32
  }
  func.func @transform_1(%arg0: i32, %arg1: i32) -> (i32, i32) {
    %c0_i32 = arith.constant 0 : i32
    %c0_i32_0 = arith.constant 0 : i32
    %c0_i32_1 = arith.constant 0 : i32
    return %c0_i32, %c0_i32_0 : i32, i32
  }
  func.func @transform_2(%arg0: i32, %arg1: i32) -> (i32, i32) {
    %c0_i32 = arith.constant 0 : i32
    %c0_i32_0 = arith.constant 0 : i32
    %c0_i32_1 = arith.constant 0 : i32
    return %c0_i32, %c0_i32_0 : i32, i32
  }
  func.func @transform_3(%arg0: i32, %arg1: i32) -> (i32, i32) {
    %c0_i32 = arith.constant 0 : i32
    %c0_i32_0 = arith.constant 0 : i32
    %c0_i32_1 = arith.constant 0 : i32
    return %c0_i32, %c0_i32_0 : i32, i32
  }
  func.func @transform_4(%arg0: i32, %arg1: i32) -> (i32, i32) {
    %c0_i32 = arith.constant 0 : i32
    %c0_i32_0 = arith.constant 0 : i32
    %c0_i32_1 = arith.constant 0 : i32
    return %c0_i32, %c0_i32_0 : i32, i32
  }
  func.func @transform_5(%arg0: i32, %arg1: i32) -> (i32, i32) {
    %c0_i32 = arith.constant 0 : i32
    %c0_i32_0 = arith.constant 0 : i32
    %c0_i32_1 = arith.constant 0 : i32
    return %c0_i32, %c0_i32_0 : i32, i32
  }
  func.func @transform_6(%arg0: i32, %arg1: i32) -> (i32, i32) {
    %c0_i32 = arith.constant 0 : i32
    %c0_i32_0 = arith.constant 0 : i32
    %c0_i32_1 = arith.constant 0 : i32
    return %c0_i32, %c0_i32_0 : i32, i32
  }
  func.func @transform_7(%arg0: i32, %arg1: i32) -> (i32, i32, i32) {
    %c0_i32 = arith.constant 0 : i32
    %c0_i32_0 = arith.constant 0 : i32
    return %arg0, %arg1, %c0_i32 : i32, i32, i32
  }
}

</mosaic_0001>

<bundles_post_ra>
// kernel: tpu_custom_call.1
= control target key start
LH: loop header
LB: loop body
LE: loop exit
PB: predicated region body
PF: predicated region fallthrough
CT: control target
= control target key end

     0   :  { %s1500_s0 = inlined_call_operand.hbm [shape: f32[2,8,32], index: 0, kind: input, shape index: {}]   ;;  %s1501_s1 = inlined_call_operand.hbm [shape: bf16[32,96], index: 1, kind: input, shape index: {}]   ;;  %s1502_s2 = inlined_call_operand.vmem [shape: f32[1,96], index: 2, kind: input, shape index: {}]   ;;  %s1503_s3 = inlined_call_operand.hbm [shape: bf16[32,32], index: 3, kind: input, shape index: {}]   ;;  %s1504_s4 = inlined_call_operand.vmem [shape: f32[1,32], index: 4, kind: input, shape index: {}]   ;;  %s1505_s5 = inlined_call_operand.vmem [shape: f32[1,32], index: 5, kind: input, shape index: {}]   ;;  %s1506_s6 = inlined_call_operand.vmem [shape: f32[1,32], index: 6, kind: input, shape index: {}]   ;;  %s1507_s7 = inlined_call_operand.hbm [shape: f32[2,8,32], index: 7, kind: output, shape index: {}]  }
   0x1   :  { %1508 = sst [smem:[#allocation13_spill]] %s1501_s1 }
   0x2   :  { %12 = vsyncpa [#allocation4], 0 }
   0x3   :  { %14 = vsyncpa [#allocation4 + $0x1], 0 }
   0x4   :  { %15 = vsyncpa [#allocation7], 0 }
   0x5   :  { %16 = vsyncpa [#allocation5], 0 }
   0x6   :  { %18 = vsyncpa [#allocation5 + $0x1], 0  ;;  %s1280_s24 = smov 0   ;;  %s1282_s25 = smov 0  }
   0x7   :  { %s1284_s26 = smov 0   ;;  %s1286_s27 = smov 0  }
   0x8   :  { %s1288_s28 = smov 0   ;;  %s1290_s29 = smov 0  }
   0x9 LB: > { %s885_s30 = sadd.s32 4294967295, %s1222_s29   ;;  %p887_p0 = scmp.ge.s32.totalorder %s1222_s29, 1  ;;  %s1222_s29 = sphi %s1290_s29, %s24_s29   ;;  %s1218_s28 = sphi %s1288_s28, %s1519_s28   ;;  %s1214_s27 = sphi %s1286_s27, %s1518_s27   ;;  %s1210_s26 = sphi %s1284_s26, %s1517_s26   ;;  %s1206_s25 = sphi %s1282_s25, %s1516_s25   ;;  %s1202_s24 = sphi %s1280_s24, %s1515_s24  }
   0xa   : > { %p1314_p1 = scmp.eq.s32.totalorder %s885_s30, 0  ;;  %p221_p2 = scmp.lt.s32.totalorder %s1222_s29, 3 }
   0xb   : > { %s1510_s1 = sld [smem:[#allocation13_spill]]  ;;  %s1224_s13 = smov [#allocation6]  }
   0xc   : > { %p1322_p3 = pnand %p887_p0, %p221_p2  ;;  %s234_s14 = sshll.u32 %s1224_s13, 4  ;;  %s235_s14 = int_to_ptr.vmem [resolvable:$true] %s234_s14 }
   0xd   : > { %p890_p6 = scmp.ge.s32.totalorder %s1222_s29, 2  ;;  %s249_s17 = sshll.u32 %s1503_s3, 4  ;;  %s250_s17 = int_to_ptr.hbm [resolvable:$true] %s249_s17 }
   0xe   : > { %p937_p4 = pneg %p1322_p3  ;;  %s1225_s18 = smov 64  }
   0xf   : > { %s1226_s19 = smov 4   ;;  %s1227_s20 = smov [#allocation8]  }
  0x10   : > { %p938_p5 = pnand %p937_p4, %p1314_p1  ;;  %s251_s21 = sshll.u32 %s1227_s20, 4  ;;  %s252_s21 = int_to_ptr.vmem [resolvable:$true] %s251_s21 }
  0x11   : > { %s232_s11 = sshll.u32 %s1510_s1, 4  ;;  %s36_s22 = sadd.s32 1, %s1218_s28  ;;  %s233_s11 = int_to_ptr.hbm [resolvable:$true] %s232_s11 }
  0x12   : > { %940 = dma.hbm_to_vmem [thread:$0]  (!%p938_p5), %s233_s11, 256, %s235_s14, [#allocation7], %s1225_s18, %s1225_s18, %s1226_s19  }
  0x13   : > { %943 = dma.hbm_to_vmem [thread:$0]  (!%p938_p5), %s250_s17, 256, %s252_s21, [#allocation7], %s1225_s18, %s1225_s18, %s1226_s19  }
  0x14   : > { %s886_s23 = sadd.s32 4294967294, %s1222_s29   ;;  %p38_p7 = scmp.ge.s32.totalorder %s36_s22, 2 }
  0x15   : > { %s43_s9 = sadd.s32 1, %s1210_s26  ;;  %p50_p8 = scmp.ne.s32.totalorder %s1210_s26, %s1206_s25 }
  0x16   : > { %s1521_s22 = smov (%p38_p7, %s36_s22), 0  ;;  %p51_p9 = scmp.eq.s32.totalorder %s1222_s29, 0 }
  0x17   : > { %p56_p10 = scmp.ne.s32.totalorder %s1206_s25, %s1202_s24  ;;  %s40_s10 = ssub.s32 %s1218_s28, %s1521_s22 }
  0x18   : > { %p208_p11 = scmp.eq.s32.totalorder %s885_s30, 1  ;;  %p41_p12 = scmp.eq.s32.totalorder %s40_s10, 0 }
  0x19   : > { %p1350_p13 = por %p1314_p1, %p56_p10  ;;  %p214_p2 = scmp.eq.s32.totalorder %s886_s23, 1 }
  0x1a   : > { %p1354_p0 = por %p208_p11, %p50_p8  ;;  %p52_p4 = por %p51_p9, %p50_p8 }
  0x1b   : > { %s1359_s14 = scalar_select %p41_p12, %s1210_s26, %s43_s9  }
  0x1c   : > { %p1361_p5 = por %p214_p2, %p56_p10  ;;  %s274_s16 = sand.u32 1, %s1210_s26  }
  0x1d   : > { %s892_s30 = sshll.u32 %s1218_s28, 3  ;;  %p954_p7 = scmp.lt.s32.totalorder %s1222_s29, 2 }
  0x1e   : > { %s891_s17 = sshll.u32 %s274_s16, 3  ;;  %s282_s20 = scalar_lea.hbm %s1500_s0, %s892_s30 }
  0x1f   : > { %s284_s21 = sshll.u32 %s282_s20, 4  ;;  %s278_s10 = scalar_lea.vmem [#allocation3], %s891_s17  ;;  %s285_s21 = int_to_ptr.hbm [resolvable:$true] %s284_s21 }
  0x20   : > { %s286_s1 = sshll.u32 %s278_s10, 4  ;;  %p945_p11 = pnand %p954_p7, %p52_p4  ;;  %s287_s1 = int_to_ptr.vmem [resolvable:$true] %s286_s1 }
  0x21   : > { %s275_s23 = scalar_lea.sflag [#allocation4], %s274_s16  ;;  %295 = sbr.rel (%p1322_p3) target bundleno = 1790 (0x6fe), region = 48 }
  0x22   : > { %947 = dma.hbm_to_vmem [thread:$0]  (!%p945_p11), %s285_s21, 128, %s287_s1, %s275_s23  }
  0x23   : > { %s1374_s9 = sand.u32 (!%p1322_p3), 1, %s1206_s25  }
  0x24   : > { %s894_s18 = sshll.u32 (!%p1322_p3), %s1374_s9, 3  ;;  %s298_s30 = scalar_lea.sflag (!%p1322_p3), [#allocation4], %s1374_s9 }
  0x25   : > { %s301_s17 = scalar_lea.vmem (!%p1322_p3), [#allocation3], %s894_s18 }
  0x26   : > { %1189 = dma.done.wait (%p1350_p13), %s298_s30, 128  }
  0x27   : > { %1191 = vsyncadd (%p1350_p13), %s298_s30, 4294967168 }
  0x28   : > { %1193 = dma.done.wait (%p1314_p1), [#allocation7], 512  }
  0x29   : > { %1195 = vsyncadd (%p1314_p1), [#allocation7], 4294966784  ;;  %v924_v0 = vld [vmem:[#allocation6 + $0x8] sm:$0xff]  ;;  %v923_v1 = vld [vmem:[#allocation6] sm:$0xff]  ;;  %vm370_vm0 = vcmask 261120   ;;  %vm388_vm1 = vcmask 781312  }
  0x2a   : > { %380 = vmatpush.bf16.msra.mxu0 %v924_v0  ;;  %v1388_v2 = vld [vmem:[%s301_s17] sm:$0xff]  ;;  %v1022_v4 = vld [vmem:[%s1502_s2] ss:$0 sm:$0xff]  ;;  %s1228_s8 = smov 88   ;;  %s1229_s11 = smov 96   ;;  %vm404_vm2 = vcmask 64512  }
  0x2b   : > { %v349_v3 = vpack.c.bf16 %v1388_v2, %v1388_v2  ;;  %s1230_s16 = smov 120   ;;  %s1231_s19 = smov 80   ;;  %vm442_vm3 = vcmask 1043456   ;;  %v460_v20 = vld [vmem:[#allocation8] sm:$0xf] }
  0x2c   : > { %s1232_s20 = smov 72   ;;  %s1233_s21 = smov 112   ;;  %v546_v23 = vsel %vm442_vm3, %v460_v20, 0  ;;  %v522_v63 = vld [vmem:[#allocation8 + $0x4] sm:$0xf] }
  0x2d   : > { %s1234_s10 = smov 56   ;;  %s1235_s23 = smov 40   ;;  %v527_v0 = vsel %vm442_vm3, %v522_v63, 0 }
  0x2e   : > { %381 = vmatpush.bf16.msra.mxu0 %v923_v1  ;;  %s1236_s30 = smov 64   ;;  %s1237_s17 = smov 104  }
  0x2f   : > { %s1238_s1 = smov 48   ;;  %s767_s12 = scalar_lea.sflag [#allocation5], %s1374_s9 }
  0x31   : > { %906 = vmatmul.msk.bf16.vlgmr.msra.gmra.mxu0 %vm370_vm0, %v349_v3 }
  0x32   : > { %536 = vmatpush.bf16.msrb.mxu0 %v527_v0 }
  0xae   : > { %v383_v5 = vpop.f32.mrf.mxu0 }
  0xaf   : > { %v384_v6 = vadd.f32 %v1022_v4, %v383_v5 }
  0xb1   : > { %v387_v7 = vpack.c.bf16 %v384_v6, %v384_v6 }
  0xb3   : > { %389 = vst.msk [vmem:[#allocation2] sm:$0xf] %vm388_vm1, %v387_v7 }
  0xb6   : > { %v385_v8 = vpop.f32.mrf.mxu0 }
  0xba   : > { %v398_v9 = vld [vmem:[#allocation2] sm:$0xf] }
  0xbb   : > { %v400_v10 = vunpack.c.l.b16 %v398_v9  ;;  %v397_v12 = vld [vmem:[#allocation2] sm:$0xf] }
  0xbc   : > { %v462_v13 = vunpack.c.l.b16 %v397_v12 }
  0xbd   : > { %v1396_v11 = vpack.c.b16 %v400_v10, %v400_v10 }
  0xbe   : > { %v1400_v14 = vpack.c.b16 %v462_v13, %v462_v13 }
  0xbf   : > { %466 = vrot.lane.b32.xlu2 %v1396_v11, %s1228_s8  ;;  %402 = vrot.lane.b32.xlu0 %v1396_v11, %s1229_s11  ;;  %s920_s11 = sshll.u32 %s1214_s27, 3  ;;  %s342_s27 = scalar_lea.vmem [#allocation9], %s894_s18 }
  0xc0   : > { %s1156_s18 = scalar_lea.hbm %s1507_s7, 16 }
  0xc7   : > { %464 = vrot.lane.b32.xlu2 %v1400_v14, %s1230_s16 }
  0xcf   : > { %563 = vrot.lane.b32.xlu2 %v1396_v11, %s1231_s19 }
  0xd7   : > { %642 = vrot.lane.b32.xlu2 %v1396_v11, %s1232_s20 }
  0xdf   : > { %561 = vrot.lane.b32.xlu2 %v1400_v14, %s1233_s21 }
 0x119   : > { %v467_v15 = vpop.permute.xlu2 %466 }
 0x11a   : > { %v472_v16 = vsel %vm404_vm2, %v467_v15, 0 }
 0x11b   : > { %481 = vmatpush.bf16.xpose.msra.mxu3 %v472_v16 }
 0x121   : > { %v465_v17 = vpop.permute.xlu2 %464 }
 0x122   : > { %909 = vmatmul.msk.bf16.vlgmr.msra.gmra.mxu3 %vm404_vm2, %v465_v17 }
 0x129   : > { %v564_v18 = vpop.permute.xlu2 %563 }
 0x12a   : > { %v569_v19 = vsel %vm404_vm2, %v564_v18, 0 }
 0x12b   : > { %578 = vmatpush.bf16.xpose.msrb.mxu3 %v569_v19 }
 0x131   : > { %v403_v21 = vpop.permute.xlu0 %402  ;;  %v643_v22 = vpop.permute.xlu2 %642 }
 0x132   : > { %v409_v24 = vsel %vm404_vm2, %v403_v21, 0  ;;  %v648_v26 = vsel %vm404_vm2, %v643_v22, 0 }
 0x133   : > { %418 = vmatpush.bf16.xpose.msra.mxu1 %v409_v24 }
 0x139   : > { %v562_v25 = vpop.permute.xlu2 %561 }
 0x13a   : > { %907 = vmatmul.msk.bf16.vlgmr.msra.gmra.mxu1 %vm404_vm2, %v397_v12  ;;  %913 = vmatmul.msk.bf16.vlgmr.msrb.gmra.mxu3 %vm404_vm2, %v562_v25 }
 0x13b   : > { %555 = vmatpush.bf16.msrb.mxu1 %v546_v23 }
 0x13f   : > { %657 = vmatpush.bf16.xpose.msra.mxu1 %v648_v26 }
 0x1a5   : > { %v483_v27 = vpop.f32.mrf.mxu3 }
 0x1a6   : > { %v487_v28 = vsel %vm404_vm2, %v483_v27, -inf }
 0x1a7   : > { %488 = vmax.xlane.f32.xlu2 %v487_v28 }
 0x1ad   : > { %v485_v29 = vpop.f32.mrf.mxu3 }
 0x1b7   : > { %v420_v30 = vpop.f32.mrf.mxu1 }
 0x1b8   : > { %v424_v31 = vsel %vm404_vm2, %v420_v30, -inf }
 0x1b9   : > { %425 = vmax.xlane.f32.xlu0 %v424_v31  ;;  %v698_v31 = vld [vmem:[#allocation8 + $0xc] sm:$0xf] }
 0x1bd   : > { %v1416_v32 = vpop.f32.mrf.mxu3 }
 0x1be   : > { %v584_v34 = vsel %vm404_vm2, %v1416_v32, -inf }
 0x1bf   : > { %v422_v33 = vpop.f32.mrf.mxu1 }
 0x1c1   : > { %585 = vmax.xlane.f32.xlu0 %v584_v34 }
 0x1c5   : > { %v582_v35 = vpop.f32.mrf.mxu3 }
 0x21a   : > { %v489_v36 = vpop.xlane.xlu2 %488 }
 0x21b   : > { %v490_v37 = vsub.f32 %v483_v27, %v489_v36  ;;  %v703_v36 = vsel %vm442_vm3, %v698_v31, 0 }
 0x21d   : > { %v491_v38 = vmul.f32 1.442695, %v490_v37 }
 0x21f   : > { %1026 = vpow2.f32 %v491_v38 }
 0x225   : > { %v1027_v39 = vpop.eup %1026 }
 0x226   : > { %v493_v40 = vsel %vm404_vm2, %v1027_v39, 0.0 }
 0x227   : > { %494 = vadd.xlane.f32.xlu0 %v493_v40  ;;  %v619_v40 = vld [vmem:[#allocation8 + $0x8] sm:$0xf] }
 0x22c   : > { %v426_v41 = vpop.xlane.xlu0 %425 }
 0x22d   : > { %v427_v42 = vsub.f32 %v420_v30, %v426_v41  ;;  %v624_v41 = vsel %vm442_vm3, %v619_v40, 0 }
 0x22e   : > { %633 = vmatpush.bf16.msra.mxu0 %v624_v41 }
 0x22f   : > { %v428_v43 = vmul.f32 1.442695, %v427_v42 }
 0x231   : > { %1028 = vpow2.f32 %v428_v43 }
 0x234   : > { %v586_v46 = vpop.xlane.xlu0 %585 }
 0x235   : > { %v587_v10 = vsub.f32 %v1416_v32, %v586_v46 }
 0x237   : > { %v1029_v44 = vpop.eup %1028  ;;  %v588_v13 = vmul.f32 1.442695, %v587_v10 }
 0x238   : > { %v430_v45 = vsel %vm404_vm2, %v1029_v44, 0.0 }
 0x239   : > { %431 = vadd.xlane.f32.xlu1 %v430_v45 }
 0x23b   : > { %500 = vrot.lane.b32.xlu0 %v1396_v11, %s1234_s10  ;;  %s778_s10 = scalar_lea.hbm %s1507_s7, %s920_s11 }
 0x243   : > { %676 = vrot.lane.b32.xlu0 %v1396_v11, %s1235_s23 }
 0x252   : > { %437 = vrot.lane.b32.xlu1 %v1396_v11, %s1236_s30 }
 0x25a   : > { %640 = vrot.lane.b32.xlu1 %v1400_v14, %s1237_s17  ;;  %s780_s17 = sshll.u32 %s342_s27, 4  ;;  %s781_s17 = int_to_ptr.vmem [resolvable:$true] %s780_s17 }
 0x29a   : > { %v495_v47 = vpop.xlane.xlu0 %494 }
 0x2ac   : > { %v432_v49 = vpop.xlane.xlu1 %431 }
 0x2ad   : > { %v501_v48 = vpop.permute.xlu0 %500  ;;  %1030 = vrcp.f32 %v432_v49 }
 0x2ae   : > { %1032 = vrcp.f32 %v495_v47  ;;  %v506_v57 = vsel %vm442_vm3, %v501_v48, 0 }
 0x2af   : > { %1034 = vpow2.f32 %v588_v13 }
 0x2b3   : > { %v1031_v52 = vpop.eup %1030 }
 0x2b4   : > { %v434_v53 = vmul.f32 0.35355338, %v1031_v52  ;;  %v1033_v59 = vpop.eup %1032 }
 0x2b5   : > { %v677_v50 = vpop.permute.xlu0 %676  ;;  %v497_v60 = vmul.f32 0.35355338, %v1033_v59  ;;  %v1035_v18 = vpop.eup %1034 }
 0x2b6   : > { %v682_v51 = vsel %vm442_vm3, %v677_v50, 0  ;;  %v435_v54 = vmul.f32 %v1029_v44, %v434_v53  ;;  %v590_v21 = vsel %vm404_vm2, %v1035_v18, 0.0  ;;  %v1023_v50 = vld [vmem:[%s1504_s4] ss:$0 sm:$0xff] }
 0x2b7   : > { %691 = vmatpush.bf16.msra.mxu3 %v682_v51  ;;  %v498_v61 = vmul.f32 %v1027_v39, %v497_v60 }
 0x2b8   : > { %v436_v58 = vpack.c.bf16 %v435_v54, %v435_v54 }
 0x2b9   : > { %v499_v62 = vpack.c.bf16 %v498_v61, %v498_v61 }
 0x2c4   : > { %v438_v55 = vpop.permute.xlu1 %437 }
 0x2c5   : > { %v444_v56 = vsel %vm442_vm3, %v438_v55, 0 }
 0x2c6   : > { %453 = vmatpush.bf16.msra.mxu2 %v444_v56 }
 0x2c9   : > { %908 = vmatmul.msk.bf16.vlgmr.msra.gmra.mxu2 %vm404_vm2, %v436_v58  ;;  %v1239_v58 = vmov 32.0  }
 0x2ca   : > { %515 = vmatpush.bf16.msrb.mxu2 %v506_v57 }
 0x2cc   : > { %v641_v7 = vpop.permute.xlu1 %640 }
 0x2d9   : > { %910 = vmatmul.msk.bf16.vlgmr.msrb.gmra.mxu2 %vm404_vm2, %v499_v62 }
 0x34c   : > { %v455_v1 = vpop.f32.mrf.mxu2 }
 0x34d   : > { %v459_v3 = vpack.c.bf16 %v455_v1, %v455_v1 }
 0x34f   : > { %912 = vmatmul.msk.bf16.vlgmr.msrb.gmra.mxu1 %vm404_vm2, %v459_v3 }
 0x354   : > { %v457_v4 = vpop.f32.mrf.mxu2 }
 0x35c   : > { %v517_v5 = vpop.f32.mrf.mxu2 }
 0x35d   : > { %v521_v6 = vpack.c.bf16 %v517_v5, %v517_v5 }
 0x35f   : > { %911 = vmatmul.msk.bf16.vlgmr.msrb.gmra.mxu0 %vm404_vm2, %v521_v6  ;;  %916 = vmatmul.msk.bf16.vlgmr.msra.gmra.mxu1 %vm404_vm2, %v641_v7 }
 0x364   : > { %v519_v8 = vpop.f32.mrf.mxu2 }
 0x3cc   : > { %v557_v9 = vpop.f32.mrf.mxu1 }
 0x3d4   : > { %v559_v12 = vpop.f32.mrf.mxu1 }
 0x3dc   : > { %v538_v14 = vpop.f32.mrf.mxu0  ;;  %v659_v15 = vpop.f32.mrf.mxu1 }
 0x3dd   : > { %v558_v16 = vadd.f32 %v557_v9, %v538_v14  ;;  %v663_v17 = vsel %vm404_vm2, %v659_v15, -inf }
 0x3de   : > { %664 = vmax.xlane.f32.xlu1 %v663_v17 }
 0x3e4   : > { %v540_v19 = vpop.f32.mrf.mxu0  ;;  %v661_v20 = vpop.f32.mrf.mxu1 }
 0x3e5   : > { %v1025_v19 = vld [vmem:[%s1506_s6] ss:$0 sm:$0xff] }
 0x3e6   : > { %591 = vadd.xlane.f32.xlu1 %v590_v21 }
 0x451   : > { %v665_v22 = vpop.xlane.xlu1 %664 }
 0x452   : > { %v666_v23 = vsub.f32 %v659_v15, %v665_v22 }
 0x454   : > { %v667_v24 = vmul.f32 1.442695, %v666_v23 }
 0x456   : > { %1036 = vpow2.f32 %v667_v24 }
 0x459   : > { %v592_v27 = vpop.xlane.xlu1 %591 }
 0x45a   : > { %1038 = vrcp.f32 %v592_v27 }
 0x45c   : > { %v1037_v25 = vpop.eup %1036 }
 0x45d   : > { %v669_v26 = vsel %vm404_vm2, %v1037_v25, 0.0 }
 0x45e   : > { %670 = vadd.xlane.f32.xlu2 %v669_v26 }
 0x460   : > { %v1039_v28 = vpop.eup %1038 }
 0x461   : > { %v594_v30 = vmul.f32 0.35355338, %v1039_v28 }
 0x463   : > { %v595_v33 = vmul.f32 %v1035_v18, %v594_v30 }
 0x465   : > { %v596_v39 = vpack.c.bf16 %v595_v33, %v595_v33 }
 0x476   : > { %597 = vrot.lane.b32.xlu2 %v1396_v11, %s1238_s1  ;;  %s782_s1 = sshll.u32 %s778_s10, 4  ;;  %s783_s1 = int_to_ptr.hbm [resolvable:$true] %s782_s1 }
 0x477   : > { %s1150_s8 = sshra.s32 %s783_s1, 4  ;;  %s1151_s8 = int_to_ptr.hbm [resolvable:$true] %s1150_s8 }
 0x478   : > { %s1152_s11 = scalar_lea.hbm %s1151_s8, 8  ;;  %p1157_p9 = scmp.lt.s32.totalorder %s1151_s8, %s1507_s7 }
 0x479   : > { %p1153_p1 = scmp.ne.s32.totalorder %s1151_s8, %s1152_s11  ;;  %p1158_p10 = scmp.lt.s32.totalorder %s1156_s18, %s1152_s11 }
 0x47b   : > { %p1154_p3 = pnand %p1153_p1, %p1354_p0  ;;  %p1159_p12 = por %p1158_p10, %p1157_p9 }
 0x47d   : > { %p1155_p8 = pneg %p1154_p3 }
 0x47f   : > { %p1160_p13 = pnand %p1159_p12, %p1155_p8 }
 0x4d1   : > { %v671_v29 = vpop.xlane.xlu2 %670 }
 0x4d2   : > { %1040 = vrcp.f32 %v671_v29 }
 0x4d3   : > { %1042 = vrcp.f32 %v1239_v58 }
 0x4d8   : > { %v1041_v32 = vpop.eup %1040 }
 0x4d9   : > { %v673_v34 = vmul.f32 0.35355338, %v1041_v32  ;;  %v598_v35 = vpop.permute.xlu2 %597  ;;  %v1043_v59 = vpop.eup %1042 }
 0x4da   : > { %v603_v37 = vsel %vm442_vm3, %v598_v35, 0  ;;  %v732_v60 = vmul.f32 32.0, %v1043_v59  ;;  %vm736_vm4 = vweird.f32 %v1043_v59 }
 0x4db   : > { %v674_v38 = vmul.f32 %v1037_v25, %v673_v34  ;;  %612 = vmatpush.bf16.msra.mxu2 %v603_v37 }
 0x4dc   : > { %v733_v61 = vsub.f32 1.0, %v732_v60 }
 0x4dd   : > { %v675_v11 = vpack.c.bf16 %v674_v38, %v674_v38 }
 0x4de   : > { %914 = vmatmul.msk.bf16.vlgmr.msra.gmra.mxu2 %vm404_vm2, %v596_v39  ;;  %v734_v62 = vmul.f32 %v1043_v59, %v733_v61 }
 0x4df   : > { %712 = vmatpush.bf16.msrb.mxu2 %v703_v36  ;;  %917 = vmatmul.msk.bf16.vlgmr.msra.gmra.mxu3 %vm404_vm2, %v675_v11 }
 0x4e0   : > { %v735_v63 = vadd.f32 %v1043_v59, %v734_v62 }
 0x4e2   : > { %v737_v0 = vsel %vm736_vm4, %v1043_v59, %v735_v63 }
 0x561   : > { %v614_v42 = vpop.f32.mrf.mxu2 }
 0x562   : > { %v618_v43 = vpack.c.bf16 %v614_v42, %v614_v42  ;;  %v693_v44 = vpop.f32.mrf.mxu3 }
 0x563   : > { %v697_v45 = vpack.c.bf16 %v693_v44, %v693_v44 }
 0x564   : > { %915 = vmatmul.msk.bf16.vlgmr.msra.gmra.mxu0 %vm404_vm2, %v618_v43 }
 0x565   : > { %918 = vmatmul.msk.bf16.vlgmr.msrb.gmra.mxu2 %vm404_vm2, %v697_v45 }
 0x569   : > { %v616_v46 = vpop.f32.mrf.mxu2 }
 0x56a   : > { %v695_v47 = vpop.f32.mrf.mxu3 }
 0x5e1   : > { %v635_v48 = vpop.f32.mrf.mxu0 }
 0x5e2   : > { %v639_v49 = vadd.f32 %v635_v48, %v558_v16  ;;  %v1024_v16 = vld [vmem:[%s1505_s5] ss:$0 sm:$0xff] }
 0x5e8   : > { %v714_v51 = vpop.f32.mrf.mxu2 }
 0x5e9   : > { %v718_v52 = vadd.f32 %v714_v51, %v639_v49  ;;  %v637_v53 = vpop.f32.mrf.mxu0 }
 0x5eb   : > { %v723_v54 = vadd.f32 %v1023_v50, %v718_v52 }
 0x5ed   : > { %v724_v55 = vadd.f32 %v723_v54, %v1388_v2 }
 0x5ef   : > { %v728_v56 = vsel %vm370_vm0, %v724_v55, 0.0 }
 0x5f0   : > { %v716_v57 = vpop.f32.mrf.mxu2  ;;  %729 = vadd.xlane.f32.xlu1 %v728_v56 }
 0x663   : > { %v730_v1 = vpop.xlane.xlu1 %729 }
 0x664   : > { %v738_v3 = vmul.f32 %v737_v0, %v730_v1 }
 0x666   : > { %v739_v4 = vsub.f32 %v724_v55, %v738_v3 }
 0x668   : > { %v740_v5 = vmul.f32 %v739_v4, %v739_v4 }
 0x66a   : > { %v741_v2 = vsel %vm370_vm0, %v740_v5, 0.0 }
 0x66b   : > { %742 = vadd.xlane.f32.xlu0 %v741_v2 }
 0x6de   : > { %v743_v6 = vpop.xlane.xlu0 %742 }
 0x6df   : > { %v744_v7 = vmul.f32 %v743_v6, %v737_v0 }
 0x6e1   : > { %v745_v8 = vadd.f32 1e-05, %v744_v7 }
 0x6e3   : > { %1044 = vrsqrt.f32 %v745_v8  ;;  %vm752_vm6 = vweird.f32 %v745_v8 }
 0x6e9   : > { %v1045_v9 = vpop.eup %1044 }
 0x6ea   : > { %v747_v10 = vmul.f32 %v1045_v9, %v745_v8  ;;  %vm753_vm5 = vweird.f32 %v1045_v9 }
 0x6eb   : > { %vm754_vm7 = vmor %vm752_vm6, %vm753_vm5 }
 0x6ec   : > { %v748_v12 = vmul.f32 %v1045_v9, %v747_v10 }
 0x6ee   : > { %v749_v13 = vmul.f32 0.5, %v748_v12 }
 0x6f0   : > { %v750_v14 = vsub.f32 1.5, %v749_v13 }
 0x6f2   : > { %v751_v15 = vmul.f32 %v1045_v9, %v750_v14 }
 0x6f4   : > { %v755_v17 = vsel %vm754_vm7, %v1045_v9, %v751_v15 }
 0x6f5   : > { %v756_v18 = vmul.f32 %v755_v17, %v739_v4 }
 0x6f7   : > { %v760_v20 = vmul.f32 %v1024_v16, %v756_v18 }
 0x6f9   : > { %v764_v21 = vadd.f32 %v1025_v19, %v760_v20 }
 0x6fb   : > { %765 = vst.msk [vmem:[%s342_s27] sm:$0xff] %vm370_vm0, %v764_v21 }
 0x6fc   : > { %1163 = shalt.err (!%p1160_p13)
}
 0x6fd   : > { %935 = dma.vmem_to_hbm [thread:$0]  (%p1354_p0), %s781_s17, 128, %s783_s1, %s767_s12  }
 0x6fe PF: > { %s794_s9 = sand.u32 1, %s1202_s24   ;;  %p949_p2 = pnand %p890_p6, %p1361_p5 }
 0x6ff   : > { %s795_s10 = scalar_lea.sflag [#allocation5], %s794_s9 }
 0x700   : > { %p950_p4 = pneg %p949_p2 }
 0x702   : > { %1197 = dma.done.wait (%p950_p4), %s795_s10, 128  }
 0x703   : > { %1199 = vsyncadd (%p950_p4), %s795_s10, 4294967168  ;;  %s24_s29 = sadd.s32 1, %s1222_s29   ;;  %s1515_s24 = smov %s1206_s25 }
 0x704   : > { %p21_p7 = scmp.ge.s32.totalorder %s24_s29, 4   ;;  %s1516_s25 = smov %s1210_s26 }
 0x705   : > { %s1517_s26 = smov %s1359_s14  ;;  %s1518_s27 = smov %s1218_s28 }
 0x706   : > { %s1519_s28 = smov %s1521_s22  ;;  %23 = sbr.rel (!%p21_p7) target bundleno = 9 (0x9), region = 107 }
 0x70b   :  { %801 = vsyncpa [#allocation4], 1 }
 0x70c   :  { %803 = vsyncpa [#allocation4 + $0x1], 1 }
 0x70d   :  { %804 = vsyncpa [#allocation7], 1 }
 0x70e   :  { %805 = vsyncpa [#allocation5], 1 }
 0x70f   :  { %807 = vsyncpa [#allocation5 + $0x1], 1 }

</bundles_post_ra>
